<compile_context>
chip_gen: v5e
topology: v5e:2x2
jax: 0.10.0
libtpu: 0.0.40
codegen_flags: <defaults>
</compile_context>

<pallas_src>
import math

import jax
import jax.numpy as jnp
from jax.experimental import pallas as pl
from jax.experimental.pallas import tpu as pltpu


_EPS = 1e-9


def _round_up(x, m):
    return ((x + m - 1) // m) * m


# ---------------------------------------------------------------------------
# In-kernel folds: aligned slice adds only (pure VPU, no cross-lane XLU work).
# ---------------------------------------------------------------------------
def _fold_lanes(x):
    """(r, c) -> (r, 128): sum aligned 128-wide column chunks."""
    c = x.shape[1]
    acc = x[:, 0:128]
    for off in range(128, c, 128):
        acc = acc + x[:, off:off + 128]
    return acc


def _fold_rows(x, out_rows):
    """(r, 128) -> (out_rows, 128): sum aligned row groups."""
    r = x.shape[0]
    acc = x[0:out_rows, :]
    for off in range(out_rows, r, out_rows):
        acc = acc + x[off:off + out_rows, :]
    return acc


# ---------------------------------------------------------------------------
# Kernels
# ---------------------------------------------------------------------------
def _sq_err_kernel(x_ref, t_ref, o_ref):
    """Accumulates a lane-dense (8,128) partial of sum((x-t)^2) per row-block."""
    j = pl.program_id(1)

    @pl.when(j == 0)
    def _():
        o_ref[...] = jnp.zeros_like(o_ref)

    d = x_ref[...].astype(jnp.float32) - t_ref[...].astype(jnp.float32)
    o_ref[...] += _fold_rows(_fold_lanes(d * d), 8)


def _weighted_kernel(x_ref, t_ref, w_ref, o_ref, ew_ref, ws_ref):
    """Per-row spatially-normalized weighted squared error.

    Emits a lane-dense (8,128) partial per row-block whose total sum equals
    sum_over_rows( sum_S(err*w) / (sum_S(w) + eps) ).
    """
    j = pl.program_id(1)

    @pl.when(j == 0)
    def _():
        ew_ref[...] = jnp.zeros_like(ew_ref)
        ws_ref[...] = jnp.zeros_like(ws_ref)

    x = x_ref[...].astype(jnp.float32)
    t = t_ref[...].astype(jnp.float32)
    w = w_ref[...].astype(jnp.float32)
    d = x - t
    ew_ref[...] += _fold_lanes(d * d * w)   # per-row lane-partials of sum(err*w)
    ws_ref[...] += _fold_lanes(w)           # per-row lane-partials of sum(w)

    @pl.when(j == pl.num_programs(1) - 1)
    def _():
        # One cross-lane reduce + exact divide per row-block (not per step).
        ws_row = jnp.sum(ws_ref[...], axis=-1, keepdims=True)       # (tb, 1)
        inv = 1.0 / (ws_row + jnp.float32(_EPS))                    # (tb, 1)
        o_ref[...] = _fold_rows(ew_ref[...] * inv, 8)               # (8, 128)


# ---------------------------------------------------------------------------
# Tile selection (generation-aware via VMEM capacity query)
# ---------------------------------------------------------------------------
def _choose_tiles(B, S, n_stream, itemsize, min_sub):
    S128 = _round_up(S, 128)
    nblk = S128 // 128
    try:
        cap = int(pltpu.get_tpu_info().vmem_capacity_bytes)
    except Exception:
        cap = 64 * 1024 * 1024          # conservative fallback: v7x per-core VMEM

    # Budget for the double-buffered streamed input tiles (leave headroom for
    # accumulator scratch, outputs and compiler temporaries).
    budget = max(4 << 20, int(cap * 0.375))   # ~24 MiB on v7x, ~48 MiB on v5e/v6e
    max_elems = budget // (n_stream * 2 * itemsize)

    row_target = 512
    b_rows = _round_up(B, min_sub)
    max_blk = 64                               # cap lane tile at 64*128 columns

    if nblk <= max_blk and S128 * min(row_target, b_rows) <= max_elems:
        ts_blk = nblk                          # whole (lane-padded) row fits
    else:
        want = max(1, min(nblk, max_blk, max_elems // (row_target * 128)))
        divs = [d for d in range(1, want + 1) if nblk % d == 0]
        best_div = max(divs) if divs else 1
        ts_blk = best_div if best_div * 2 >= want else want
    ts = ts_blk * 128

    tb = min(max(1, max_elems // ts), 1024, b_rows)
    tb = max(min_sub, (tb // min_sub) * min_sub)
    return tb, ts, cap


def _pad2d(x, b_pad, s_pad):
    b, s = x.shape
    if b_pad == b and s_pad == s:
        return x
    return jnp.pad(x, ((0, b_pad - b), (0, s_pad - s)))


# ---------------------------------------------------------------------------
# Public entry point (forward-pass semantics of WeightedL2Loss)
# ---------------------------------------------------------------------------
def weighted_l2_loss(inp, target, weight=None, size_average=True):
    assert inp.shape == target.shape
    shape = inp.shape
    assert len(shape) >= 2, "expect at least 2 dims (last two are spatial)"
    S = shape[-1] * shape[-2]
    B = max(1, math.prod(shape[:-2]))
    total = B * S

    x2 = inp.reshape(B, S)
    t2 = target.reshape(B, S)

    use_weight = size_average and (weight is not None)
    if use_weight:
        w2 = jnp.broadcast_to(weight, shape).reshape(B, S)
        streams = (x2, t2, w2)
    else:
        streams = (x2, t2)

    itemsize = max(jnp.dtype(a.dtype).itemsize for a in streams)
    # Packed-tile minimum sublane count: f32 -> 8, bf16 -> 16, 8-bit -> 32.
    min_sub = max(8, max(32 // jnp.dtype(a.dtype).itemsize for a in streams))

    tb, ts, cap = _choose_tiles(B, S, len(streams), itemsize, min_sub)
    b_pad = _round_up(B, tb)
    s_pad = _round_up(S, ts)
    streams = tuple(_pad2d(a, b_pad, s_pad) for a in streams)

    nb, ns = b_pad // tb, s_pad // ts
    in_spec = pl.BlockSpec((tb, ts), lambda i, j: (i, j))
    out_spec = pl.BlockSpec((8, 128), lambda i, j: (i, 0))
    out_shape = jax.ShapeDtypeStruct((nb * 8, 128), jnp.float32)

    tile_bytes = len(streams) * 2 * tb * ts * itemsize
    scratch_bytes = 2 * tb * 128 * 4 + 4 * 8 * 128 * 4
    vmem_limit = tile_bytes + scratch_bytes + (32 << 20)
    vmem_limit = int(max(16 << 20, min(vmem_limit, cap - (4 << 20))))

    cparams = pltpu.CompilerParams(
        dimension_semantics=("parallel", "arbitrary"),
        vmem_limit_bytes=vmem_limit,
    )

    if use_weight:
        partial = pl.pallas_call(
            _weighted_kernel,
            grid=(nb, ns),
            in_specs=[in_spec, in_spec, in_spec],
            out_specs=out_spec,
            out_shape=out_shape,
            scratch_shapes=[pltpu.VMEM((tb, 128), jnp.float32),
                            pltpu.VMEM((tb, 128), jnp.float32)],
            compiler_params=cparams,
        )(*streams)
        return partial.sum() / jnp.float32(B)          # .mean() over N*C rows

    partial = pl.pallas_call(
        _sq_err_kernel,
        grid=(nb, ns),
        in_specs=[in_spec, in_spec],
        out_specs=out_spec,
        out_shape=out_shape,
        compiler_params=cparams,
    )(*streams)

    if not size_average:
        return partial.sum()                            # err.sum()
    return partial.sum() / jnp.float32(total)           # err.mean()


# ---------------------------------------------------------------------------
# Reference + self-test
# ---------------------------------------------------------------------------
def _reference_loss(inp, target, weight=None, size_average=True):
    err = (inp - target) ** 2
    if not size_average:
        return err.sum()
    if weight is None:
        return err.mean()
    wsm = weight / (weight.sum(axis=(-1, -2), keepdims=True) + _EPS)
    return (err * wsm).sum(axis=(-1, -2)).mean()


if __name__ == "__main__":
    key = jax.random.PRNGKey(0)
    k_x, k_t, k_w, k_x2, k_t2, k_w2 = jax.random.split(key, 6)

    # Main case: aligned NCHW.
    N, C, H, W = 2, 4, 16, 16
    x = jax.random.normal(k_x, (N, C, H, W), dtype=jnp.float32)
    t = jax.random.normal(k_t, (N, C, H, W), dtype=jnp.float32)
    w = jax.random.uniform(k_w, (N, C, H, W), dtype=jnp.float32)

    out_w = jax.block_until_ready(weighted_l2_loss(x, t, weight=w, size_average=True))
    ref_w = _reference_loss(x, t, weight=w, size_average=True)
    assert jnp.allclose(out_w, ref_w, rtol=1e-5, atol=1e-6), (out_w, ref_w)

    out_m = jax.block_until_ready(weighted_l2_loss(x, t, weight=None, size_average=True))
    ref_m = _reference_loss(x, t, weight=None, size_average=True)
    assert jnp.allclose(out_m, ref_m, rtol=1e-5, atol=1e-6), (out_m, ref_m)

    out_s = jax.block_until_ready(weighted_l2_loss(x, t, weight=w, size_average=False))
    ref_s = _reference_loss(x, t, weight=w, size_average=False)
    assert jnp.allclose(out_s, ref_s, rtol=1e-5, atol=1e-5), (out_s, ref_s)

    # Unaligned case: exercises the row/lane zero-padding path (B=6, S=120).
    N2, C2, H2, W2 = 2, 3, 10, 12
    x2 = jax.random.normal(k_x2, (N2, C2, H2, W2), dtype=jnp.float32)
    t2 = jax.random.normal(k_t2, (N2, C2, H2, W2), dtype=jnp.float32)
    w2 = jax.random.uniform(k_w2, (N2, C2, H2, W2), dtype=jnp.float32)

    out_p = jax.block_until_ready(weighted_l2_loss(x2, t2, weight=w2, size_average=True))
    ref_p = _reference_loss(x2, t2, weight=w2, size_average=True)
    assert jnp.allclose(out_p, ref_p, rtol=1e-5, atol=1e-6), (out_p, ref_p)

    out_p2 = jax.block_until_ready(weighted_l2_loss(x2, t2, weight=None, size_average=True))
    ref_p2 = _reference_loss(x2, t2, weight=None, size_average=True)
    assert jnp.allclose(out_p2, ref_p2, rtol=1e-5, atol=1e-6), (out_p2, ref_p2)

    print("KERNEL_OK")
</pallas_src>

<mosaic_0001>
module attributes {stable_mosaic.version = 11 : i64} {
  func.func @_weighted_kernel(%arg0: i32, %arg1: i32, %arg2: memref<8x256xf32, #tpu.memory_space<vmem>>, %arg3: memref<8x256xf32, #tpu.memory_space<vmem>>, %arg4: memref<8x256xf32, #tpu.memory_space<vmem>>, %arg5: memref<8x128xf32, #tpu.memory_space<vmem>>, %arg6: memref<8x128xf32, #tpu.memory_space<vmem>>, %arg7: memref<8x128xf32, #tpu.memory_space<vmem>>) attributes {dimension_semantics = [#tpu.dimension_semantics<parallel>, #tpu.dimension_semantics<arbitrary>], iteration_bounds = array<i64: 1, 1>, scalar_prefetch = 0 : i64, scratch_operands = 2 : i64, tpu.core_type = #tpu.core_type<tc>, window_params = [{transform_indices = @transform_0, window_bounds = array<i64: 8, 256>}, {transform_indices = @transform_1, window_bounds = array<i64: 8, 256>}, {transform_indices = @transform_2, window_bounds = array<i64: 8, 256>}, {transform_indices = @transform_3, window_bounds = array<i64: 8, 128>}]} {
    %c0_i32 = arith.constant 0 : i32
    %0 = arith.cmpi eq, %arg1, %c0_i32 : i32
    %1 = arith.extui %0 : i1 to i32
    %c0_i32_0 = arith.constant 0 : i32
    %2 = arith.cmpi ne, %1, %c0_i32_0 : i32
    scf.if %2 {
      %cst = arith.constant 0.000000e+00 : f32
      %24 = vector.broadcast %cst : f32 to vector<8x128xf32>
      %c0_16 = arith.constant 0 : index
      %c0_17 = arith.constant 0 : index
      %25 = vector.load %arg6[%c0_16, %c0_17] : memref<8x128xf32, #tpu.memory_space<vmem>>, vector<8x128xf32>
      tpu.vector_store %arg6[%c0_16, %c0_17], %24 {strides = array<i32>} : memref<8x128xf32, #tpu.memory_space<vmem>>, vector<8x128xf32>,
      %cst_18 = arith.constant 0.000000e+00 : f32
      %26 = vector.broadcast %cst_18 : f32 to vector<8x128xf32>
      %c0_19 = arith.constant 0 : index
      %c0_20 = arith.constant 0 : index
      %27 = vector.load %arg7[%c0_19, %c0_20] : memref<8x128xf32, #tpu.memory_space<vmem>>, vector<8x128xf32>
      tpu.vector_store %arg7[%c0_19, %c0_20], %26 {strides = array<i32>} : memref<8x128xf32, #tpu.memory_space<vmem>>, vector<8x128xf32>,
    } else {
    }
    %c0 = arith.constant 0 : index
    %c0_1 = arith.constant 0 : index
    %3 = vector.load %arg2[%c0, %c0_1] : memref<8x256xf32, #tpu.memory_space<vmem>>, vector<8x256xf32>
    %c0_2 = arith.constant 0 : index
    %c0_3 = arith.constant 0 : index
    %4 = vector.load %arg3[%c0_2, %c0_3] : memref<8x256xf32, #tpu.memory_space<vmem>>, vector<8x256xf32>
    %c0_4 = arith.constant 0 : index
    %c0_5 = arith.constant 0 : index
    %5 = vector.load %arg4[%c0_4, %c0_5] : memref<8x256xf32, #tpu.memory_space<vmem>>, vector<8x256xf32>
    %6 = arith.subf %3, %4 : vector<8x256xf32>
    %c0_6 = arith.constant 0 : index
    %c0_7 = arith.constant 0 : index
    %7 = vector.load %arg6[%c0_6, %c0_7] : memref<8x128xf32, #tpu.memory_space<vmem>>, vector<8x128xf32>
    %8 = arith.mulf %6, %6 : vector<8x256xf32>
    %9 = arith.mulf %8, %5 : vector<8x256xf32>
    %10 = vector.extract_strided_slice %9 {offsets = [0, 0], sizes = [8, 128], strides = [1, 1]} : vector<8x256xf32> to vector<8x128xf32>
    %11 = vector.extract_strided_slice %9 {offsets = [0, 128], sizes = [8, 128], strides = [1, 1]} : vector<8x256xf32> to vector<8x128xf32>
    %12 = arith.addf %10, %11 : vector<8x128xf32>
    %13 = arith.addf %7, %12 : vector<8x128xf32>
    %c0_8 = arith.constant 0 : index
    %c0_9 = arith.constant 0 : index
    %14 = vector.load %arg6[%c0_8, %c0_9] : memref<8x128xf32, #tpu.memory_space<vmem>>, vector<8x128xf32>
    tpu.vector_store %arg6[%c0_8, %c0_9], %13 {strides = array<i32>} : memref<8x128xf32, #tpu.memory_space<vmem>>, vector<8x128xf32>,
    %c0_10 = arith.constant 0 : index
    %c0_11 = arith.constant 0 : index
    %15 = vector.load %arg7[%c0_10, %c0_11] : memref<8x128xf32, #tpu.memory_space<vmem>>, vector<8x128xf32>
    %16 = vector.extract_strided_slice %5 {offsets = [0, 0], sizes = [8, 128], strides = [1, 1]} : vector<8x256xf32> to vector<8x128xf32>
    %17 = vector.extract_strided_slice %5 {offsets = [0, 128], sizes = [8, 128], strides = [1, 1]} : vector<8x256xf32> to vector<8x128xf32>
    %18 = arith.addf %16, %17 : vector<8x128xf32>
    %19 = arith.addf %15, %18 : vector<8x128xf32>
    %c0_12 = arith.constant 0 : index
    %c0_13 = arith.constant 0 : index
    %20 = vector.load %arg7[%c0_12, %c0_13] : memref<8x128xf32, #tpu.memory_space<vmem>>, vector<8x128xf32>
    tpu.vector_store %arg7[%c0_12, %c0_13], %19 {strides = array<i32>} : memref<8x128xf32, #tpu.memory_space<vmem>>, vector<8x128xf32>,
    %c0_i32_14 = arith.constant 0 : i32
    %21 = arith.cmpi eq, %arg1, %c0_i32_14 : i32
    %22 = arith.extui %21 : i1 to i32
    %c0_i32_15 = arith.constant 0 : i32
    %23 = arith.cmpi ne, %22, %c0_i32_15 : i32
    scf.if %23 {
      %c0_16 = arith.constant 0 : index
      %c0_17 = arith.constant 0 : index
      %24 = vector.load %arg7[%c0_16, %c0_17] : memref<8x128xf32, #tpu.memory_space<vmem>>, vector<8x128xf32>
      %cst = arith.constant dense<0.000000e+00> : vector<8xf32>
      %25 = vector.multi_reduction <add>, %24, %cst [1] : vector<8x128xf32> to vector<8xf32>
      %26 = vector.shape_cast %25 : vector<8xf32> to vector<8x1xf32>
      %cst_18 = arith.constant 9.99999971E-10 : f32
      %27 = vector.broadcast %cst_18 : f32 to vector<8x1xf32>
      %28 = arith.addf %26, %27 : vector<8x1xf32>
      %cst_19 = arith.constant 1.000000e+00 : f32
      %29 = vector.broadcast %cst_19 : f32 to vector<8x1xf32>
      %30 = arith.divf %29, %28 : vector<8x1xf32>
      %c0_20 = arith.constant 0 : index
      %c0_21 = arith.constant 0 : index
      %31 = vector.load %arg6[%c0_20, %c0_21] : memref<8x128xf32, #tpu.memory_space<vmem>>, vector<8x128xf32>
      %32 = vector.broadcast %30 : vector<8x1xf32> to vector<8x128xf32>
      %33 = arith.mulf %31, %32 : vector<8x128xf32>
      %c0_22 = arith.constant 0 : index
      %c0_23 = arith.constant 0 : index
      %34 = vector.load %arg5[%c0_22, %c0_23] : memref<8x128xf32, #tpu.memory_space<vmem>>, vector<8x128xf32>
      tpu.vector_store %arg5[%c0_22, %c0_23], %33 {strides = array<i32>} : memref<8x128xf32, #tpu.memory_space<vmem>>, vector<8x128xf32>,
    } else {
    }
    return
  }
  func.func @transform_0(%arg0: i32, %arg1: i32) -> (i32, i32) {
    %c0_i32 = arith.constant 0 : i32
    return %arg0, %arg1 : i32, i32
  }
  func.func @transform_1(%arg0: i32, %arg1: i32) -> (i32, i32) {
    %c0_i32 = arith.constant 0 : i32
    return %arg0, %arg1 : i32, i32
  }
  func.func @transform_2(%arg0: i32, %arg1: i32) -> (i32, i32) {
    %c0_i32 = arith.constant 0 : i32
    return %arg0, %arg1 : i32, i32
  }
  func.func @transform_3(%arg0: i32, %arg1: i32) -> (i32, i32) {
    %c0_i32 = arith.constant 0 : i32
    %c0_i32_0 = arith.constant 0 : i32
    return %arg0, %c0_i32 : i32, i32
  }
}

</mosaic_0001>

<bundles_post_ra>
// kernel: tpu_custom_call.1
= control target key start
LH: loop header
LB: loop body
LE: loop exit
PB: predicated region body
PF: predicated region fallthrough
CT: control target
= control target key end

     0   :  { %8 = vsyncpa [#allocation5], 0  ;;  %s269_s0 = inlined_call_operand.hbm [shape: f32[8,256], index: 0, kind: input, shape index: {}]   ;;  %s270_s1 = inlined_call_operand.hbm [shape: f32[8,256], index: 1, kind: input, shape index: {}]   ;;  %s271_s2 = inlined_call_operand.hbm [shape: f32[8,256], index: 2, kind: input, shape index: {}]   ;;  %s272_s3 = inlined_call_operand.hbm [shape: f32[8,128], index: 3, kind: output, shape index: {}]  }
   0x1   :  { %9 = vsyncpa [#allocation8], 0  ;;  %s27_s14 = sshll.u32 %s270_s1, 4  ;;  %s28_s14 = int_to_ptr.hbm [resolvable:$true] %s27_s14 }
   0x2   :  { %10 = vsyncpa [#allocation6], 0  ;;  %s233_s15 = smov [#allocation7]   ;;  %s16_s19 = sshll.u32 %s269_s0, 4  ;;  %s17_s19 = int_to_ptr.hbm [resolvable:$true] %s16_s19 }
   0x3   :  { %s29_s16 = sshll.u32 %s233_s15, 4  ;;  %s234_s20 = smov [#allocation4]   ;;  %s30_s16 = int_to_ptr.vmem [resolvable:$true] %s29_s16 }
   0x4   :  { %32 = dma.hbm_to_vmem [thread:$0]  %s28_s14, 256, %s30_s16, [#allocation8]  }
   0x5   :  { %s18_s21 = sshll.u32 %s234_s20, 4  ;;  %s38_s24 = sshll.u32 %s271_s2, 4  ;;  %s19_s21 = int_to_ptr.vmem [resolvable:$true] %s18_s21  ;;  %s39_s24 = int_to_ptr.hbm [resolvable:$true] %s38_s24 }
   0x6   :  { %21 = dma.hbm_to_vmem [thread:$0]  %s17_s19, 256, %s19_s21, [#allocation5]  }
   0x7   :  { %s235_s1 = smov [#allocation9]  }
   0x8   :  { %s40_s25 = sshll.u32 %s235_s1, 4  ;;  %s41_s25 = int_to_ptr.vmem [resolvable:$true] %s40_s25 }
   0x9   :  { %43 = dma.hbm_to_vmem [thread:$0]  %s39_s24, 256, %s41_s25, [#allocation8]  }
   0xa   :  { %227 = dma.done.wait [#allocation5], 256  }
   0xb   :  { %228 = vsyncadd [#allocation5], 4294967040 }
   0xc   :  { %229 = dma.done.wait [#allocation8], 512  }
   0xd   :  { %230 = vsyncadd [#allocation8], 4294966784  ;;  %v62_v0 = vld [vmem:[#allocation4] sm:$0xff]  ;;  %v63_v1 = vld [vmem:[#allocation4 + $0x8] sm:$0xff]  ;;  %s236_s0 = smov [#allocation10]   ;;  %s114_s28 = sshll.u32 %s272_s3, 4  ;;  %s115_s28 = int_to_ptr.hbm [resolvable:$true] %s114_s28 }
   0xe   :  { %v64_v2 = vld [vmem:[#allocation7] sm:$0xff]  ;;  %v65_v3 = vld [vmem:[#allocation7 + $0x8] sm:$0xff]  ;;  %v66_v4 = vld [vmem:[#allocation9] sm:$0xff]  ;;  %s112_s2 = sshll.u32 %s236_s0, 4  ;;  %s113_s2 = int_to_ptr.vmem [resolvable:$true] %s112_s2 }
   0xf   :  { %v67_v5 = vld [vmem:[#allocation9 + $0x8] sm:$0xff]  ;;  %v68_v6 = vsub.f32 %v62_v0, %v64_v2  ;;  %v69_v7 = vsub.f32 %v63_v1, %v65_v3 }
  0x10   :  { %v79_v8 = vadd.f32 %v67_v5, %v66_v4 }
  0x11   :  { %v71_v9 = vmul.f32 %v68_v6, %v68_v6  ;;  %v72_v10 = vmul.f32 %v69_v7, %v69_v7 }
  0x12   :  { %86 = vadd.xlane.f32.xlu0 %v79_v8 }
  0x13   :  { %v73_v11 = vmul.f32 %v71_v9, %v66_v4  ;;  %v74_v12 = vmul.f32 %v72_v10, %v67_v5 }
  0x15   :  { %v75_v13 = vadd.f32 %v74_v12, %v73_v11 }
  0x85   :  { %v87_v14 = vpop.xlane.xlu0 %86 }
  0x86   :  { %v88_v15 = vadd.f32 1e-09, %v87_v14 }
  0x88   :  { %129 = vrcp.f32 %v88_v15  ;;  %v100_v19 = vand.u32 2147483648, %v88_v15  ;;  %v98_v21 = vand.u32 2147483647, %v88_v15  ;;  %vm94_vm1 = vweird.f32 %v88_v15 }
  0x8a   :  { %v101_v23 = vor.u32 1.1754944e-38, %v100_v19  ;;  %vm99_vm3 = vcmp.eq.f32.partialorder %v98_v21, 8.507059e+37 }
  0x8e   :  { %v130_v16 = vpop.eup %129 }
  0x8f   :  { %v90_v17 = vmul.f32 %v130_v16, %v88_v15  ;;  %vm95_vm0 = vweird.f32 %v130_v16 }
  0x90   :  { %vm96_vm2 = vmor %vm94_vm1, %vm95_vm0 }
  0x91   :  { %v91_v18 = vsub.f32 1.0, %v90_v17 }
  0x93   :  { %v92_v20 = vmul.f32 %v130_v16, %v91_v18 }
  0x95   :  { %v93_v22 = vadd.f32 %v130_v16, %v92_v20 }
  0x97   :  { %v97_v24 = vsel %vm96_vm2, %v130_v16, %v93_v22 }
  0x98   :  { %v102_v25 = vsel %vm99_vm3, %v101_v23, %v97_v24 }
  0x99   :  { %v105_v26 = vmul.f32 %v102_v25, %v75_v13 }
  0x9b   :  { %106 = vst [vmem:[#allocation10] sm:$0xff] %v105_v26 }
  0x9c   :  { %117 = dma.vmem_to_hbm [thread:$0]  %s113_s2, 128, %s115_s28, [#allocation6]  }
  0x9d   :  { %231 = dma.done.wait [#allocation6], 128  }
  0x9e   :  { %232 = vsyncadd [#allocation6], 4294967168 }
  0x9f   :  { %122 = vsyncpa [#allocation5], 1 }
  0xa0   :  { %123 = vsyncpa [#allocation8], 1 }
  0xa1   :  { %124 = vsyncpa [#allocation6], 1 }

</bundles_post_ra>
